<compile_context>
chip_gen: v7x
topology: tpu7x:2x2x1
jax: 0.10.0
libtpu: 0.0.40
codegen_flags: <defaults>
</compile_context>

<pallas_src>
import numpy as np
import jax
import jax.numpy as jnp
from jax.experimental import pallas as pl
from jax.experimental.pallas import tpu as pltpu

_VMEM_BUDGET = 48 * 1024 * 1024   # conservative: leaves headroom on v7x (64 MiB)
_ROW_TILE_CAP = 1024


def _round_up(x, m):
    return ((x + m - 1) // m) * m


def build_pooling_matrix(neigh_orders, num_vertices, dtype=jnp.bfloat16):
    """P[v, m] = multiplicity of vertex v among the 7 neighbors of coarse vertex m.

    Pure function of the static mesh topology -- build once per level and
    reuse.  Counts are small integers (0..7), exactly representable in bf16.
    """
    M = (num_vertices + 6) // 4
    M_pad = _round_up(M, 128)                       # lane-dense output width
    idx = np.asarray(jax.device_get(neigh_orders)).reshape(-1)[: 7 * M]
    idx = idx.astype(np.int64).reshape(M, 7)
    if idx.min() < 0 or idx.max() >= num_vertices:
        raise ValueError(
            "neigh_orders contains indices outside [0, num_vertices); a silent "
            "scatter-drop would produce wrong means.")
    P = np.zeros((num_vertices, M_pad), np.float32)
    np.add.at(P, (idx, np.arange(M, dtype=np.int64)[:, None]), 1.0)
    return jnp.asarray(P).astype(dtype)


def _pool_mean_kernel(x_ref, p_ref, o_ref):
    # x_ref: [TR, N]   row tile of flattened [B*F, N] input (original dtype)
    # p_ref: [N, TM]   pooling-count tile (or full [N, M_pad] resident slab)
    # o_ref: [TR, TM]  lane-dense output tile (TM % 128 == 0)
    x = x_ref[...].astype(p_ref.dtype)      # cast in-VMEM, not in the wrapper
    acc = jnp.dot(x, p_ref[...], preferred_element_type=jnp.float32)
    o_ref[...] = (acc * (1.0 / 7.0)).astype(o_ref.dtype)


def _choose_tiles(R, N, M_pad, p_elem_bytes):
    # Output-lane (M) tiling only when the full P slab would crowd VMEM.
    if M_pad <= 512:
        TM, p_bufs = M_pad, 1       # P fully resident: single copy, no dbl-buf
    else:
        TM, p_bufs = 128, 2         # P streams along the M grid axis
        for cand in (1024, 512, 256):
            if M_pad % cand == 0 and 2 * N * cand * p_elem_bytes <= _VMEM_BUDGET // 2:
                TM = cand
                break
    p_vmem = p_bufs * N * TM * p_elem_bytes
    # Row tiling: dbl-buffered x tile + dbl-buffered out tile + in-kernel cast temp.
    per_row = 2 * (N * 4 + TM * 4) + N * p_elem_bytes
    budget_rows = max((_VMEM_BUDGET - p_vmem) // per_row, 16)
    TR = min(_ROW_TILE_CAP, int(budget_rows))
    TR = max(16, (TR // 16) * 16)            # bf16 sublane packing
    TR = min(TR, _round_up(R, 16))           # don't over-tile tiny batches
    vmem_bytes = p_vmem + TR * per_row
    return TR, TM, vmem_bytes


def _pool_mean_2d(x2d, P):
    R, N = x2d.shape
    n_p, M_pad = P.shape
    assert n_p == N, (n_p, N)
    p_elem = jnp.dtype(P.dtype).itemsize
    TR, TM, vmem_bytes = _choose_tiles(R, N, M_pad, p_elem)
    grid_r = pl.cdiv(R, TR)
    grid_m = M_pad // TM

    if grid_m == 1:
        # Constant operand: one full-array VMEM-resident copy, no pipelining.
        p_spec = pl.BlockSpec(memory_space=pltpu.MemorySpace.VMEM)
    else:
        p_spec = pl.BlockSpec((N, TM), lambda i, j: (0, j))

    x_bytes = x2d.dtype.itemsize
    p_reads = 1 if grid_m == 1 else grid_r
    flops = 2 * R * N * M_pad
    bytes_accessed = (R * N * x_bytes
                      + p_reads * N * M_pad * p_elem
                      + R * M_pad * x_bytes)
    vmem_limit = int(min(max(vmem_bytes + (8 << 20), 32 << 20), 120 << 20))

    return pl.pallas_call(
        _pool_mean_kernel,
        out_shape=jax.ShapeDtypeStruct((R, M_pad), x2d.dtype),
        grid=(grid_r, grid_m),
        in_specs=[
            # Full-extent lane dim (N) -> no wrapper padding pass over x needed.
            pl.BlockSpec((TR, N), lambda i, j: (i, 0)),
            p_spec,
        ],
        out_specs=pl.BlockSpec((TR, TM), lambda i, j: (i, j)),
        compiler_params=pltpu.CompilerParams(
            dimension_semantics=("parallel", "parallel"),
            vmem_limit_bytes=vmem_limit),
        cost_estimate=pl.CostEstimate(
            flops=flops, bytes_accessed=bytes_accessed, transcendentals=0),
    )(x2d, P)


def pool_layer_batch_mean(x, neigh_orders=None, *, pool_matrix=None,
                          compute_dtype=jnp.bfloat16):
    """Forward of pool_layer_batch (pooling_type='mean'): [B,F,N] -> [B,F,(N+6)//4].

    Prefer make_pool_layer_batch_mean(...) so the pooling matrix is built once
    per mesh level.  compute_dtype=jnp.float32 gives bit-closer parity with the
    f32 reference; bf16 halves P traffic and uses the fast MXU path.
    """
    B, F, N = x.shape
    M = (N + 6) // 4
    if pool_matrix is None:
        pool_matrix = build_pooling_matrix(neigh_orders, N, dtype=compute_dtype)
    out2d = _pool_mean_2d(x.reshape(B * F, N), pool_matrix)
    return out2d[:, :M].reshape(B, F, M)


def make_pool_layer_batch_mean(neigh_orders, num_vertices, *,
                               compute_dtype=jnp.bfloat16):
    """Build P once (hoisted out of the per-call path) and return a jitted forward."""
    P = build_pooling_matrix(neigh_orders, num_vertices, dtype=compute_dtype)

    @jax.jit
    def forward(x):
        return pool_layer_batch_mean(x, pool_matrix=P)

    return forward


if __name__ == "__main__":
    key = jax.random.PRNGKey(0)
    # icosphere level with 162 vertices -> (162+6)/4 = 42 coarse vertices
    B, F, N = 2, 4, 162
    M = (N + 6) // 4

    kx, ki = jax.random.split(key)
    x = jax.random.normal(kx, (B, F, N), dtype=jnp.float32)
    # deterministic synthetic 1-ring neighborhood table (7 indices per coarse vertex)
    neigh_orders = jax.random.randint(ki, (7 * M,), 0, N, dtype=jnp.int32)

    pool = make_pool_layer_batch_mean(neigh_orders, N)
    out = jax.block_until_ready(pool(x))

    # pure-JAX mirror of the PyTorch forward (pooling_type='mean'), in f32
    ref = jnp.mean(x[:, :, neigh_orders[: 7 * M]].reshape(B, F, M, 7), axis=3)

    assert out.shape == (B, F, M), out.shape
    # bf16 MXU path with f32 accumulation: tolerate bf16 input-rounding error.
    err = float(jnp.max(jnp.abs(out - ref)))
    assert jnp.allclose(out, ref, atol=2e-2, rtol=2e-2), err
    print("KERNEL_OK")
</pallas_src>

<mosaic_0001>
module attributes {stable_mosaic.version = 11 : i64} {
  func.func @_pool_mean_kernel(%arg0: i32, %arg1: i32, %arg2: memref<16x162xf32, #tpu.memory_space<vmem>>, %arg3: memref<162x128xbf16, #tpu.memory_space<vmem>>, %arg4: memref<16x128xf32, #tpu.memory_space<vmem>>) attributes {dimension_semantics = [#tpu.dimension_semantics<parallel>, #tpu.dimension_semantics<parallel>], iteration_bounds = array<i64: 1, 1>, scalar_prefetch = 0 : i64, scratch_operands = 0 : i64, tpu.core_type = #tpu.core_type<tc>, window_params = [{transform_indices = @transform_0, window_bounds = array<i64: 16, 162>}, {pipeline_mode = #tpu.pipeline_mode<synchronous>, transform_indices = @transform_1, window_bounds = array<i64: 162, 128>}, {transform_indices = @transform_2, window_bounds = array<i64: 16, 128>}]} {
    %c0 = arith.constant 0 : index
    %c0_0 = arith.constant 0 : index
    %0 = vector.load %arg2[%c0, %c0_0] : memref<16x162xf32, #tpu.memory_space<vmem>>, vector<16x162xf32>
    %1 = arith.truncf %0 : vector<16x162xf32> to vector<16x162xbf16>
    %c0_1 = arith.constant 0 : index
    %c0_2 = arith.constant 0 : index
    %2 = vector.load %arg3[%c0_1, %c0_2] : memref<162x128xbf16, #tpu.memory_space<vmem>>, vector<162x128xbf16>
    %cst = arith.constant dense<0.000000e+00> : vector<16x128xf32>
    %3 = tpu.matmul %1, %2, %cst {dimension_numbers = #tpu.dot_dimension_numbers<[1], [0], [0], [1], [0, 0, 1, 1], [], []>} : vector<16x162xbf16>, vector<162x128xbf16>, vector<16x128xf32> -> vector<16x128xf32>
    %cst_3 = arith.constant 0.142857149 : f32
    %4 = vector.broadcast %cst_3 : f32 to vector<16x128xf32>
    %5 = arith.mulf %3, %4 : vector<16x128xf32>
    %c0_4 = arith.constant 0 : index
    %c0_5 = arith.constant 0 : index
    %6 = vector.load %arg4[%c0_4, %c0_5] : memref<16x128xf32, #tpu.memory_space<vmem>>, vector<16x128xf32>
    tpu.vector_store %arg4[%c0_4, %c0_5], %5 {strides = array<i32>} : memref<16x128xf32, #tpu.memory_space<vmem>>, vector<16x128xf32>,
    return
  }
  func.func @transform_0(%arg0: i32, %arg1: i32) -> (i32, i32) {
    %c0_i32 = arith.constant 0 : i32
    %c0_i32_0 = arith.constant 0 : i32
    return %arg0, %c0_i32 : i32, i32
  }
  func.func @transform_1(%arg0: i32, %arg1: i32) -> (i32, i32) {
    %c0_i32 = arith.constant 0 : i32
    %c0_i32_0 = arith.constant 0 : i32
    %c0_i32_1 = arith.constant 0 : i32
    return %c0_i32, %c0_i32_0 : i32, i32
  }
  func.func @transform_2(%arg0: i32, %arg1: i32) -> (i32, i32) {
    %c0_i32 = arith.constant 0 : i32
    return %arg0, %arg1 : i32, i32
  }
}

</mosaic_0001>

<bundles_post_ra>
// kernel: forward.1
= control target key start
LH: loop header
LB: loop body
LE: loop exit
PB: predicated region body
PF: predicated region fallthrough
CT: control target
= control target key end

     0   :  { %7 = vsyncpa [#allocation3], 0  ;;  %s323_s0 = inlined_call_operand.vmem [shape: f32[8,162], index: 0, kind: input, shape index: {}]   ;;  %s324_s1 = inlined_call_operand.hbm [shape: bf16[162,128], index: 1, kind: input, shape index: {}]   ;;  %s325_s2 = inlined_call_operand.hbm [shape: f32[8,128], index: 2, kind: output, shape index: {}]  }
   0x1   :  { %8 = vsyncpa [#allocation4], 0  ;;  %s265_s9 = smov [#allocation2]   ;;  %s217_s13 = scalar_lea.hbm %s324_s1, 1344 }
   0x2   :  { %s16_s10 = sshll.u32 %s265_s9, 4  ;;  %p218_p0 = scmp.ne.s32.totalorder %s324_s1, %s217_s13  ;;  %s17_s10 = int_to_ptr.vmem [resolvable:$true] %s16_s10 }
   0x3   :  { %p221_p1 = scmp.lt.u32.totalorder %s217_s13, %s324_s1 }
   0x5   :  { %p223_p2 = pnand %p221_p1, %p218_p0 }
   0x7   :  { %226 = shalt.err (!%p223_p2)
}
   0x8   :  { %s227_s18 = scalar_lea.vmem %s17_s10, 1344  ;;  %p232_p4 = scmp.lt.s32.totalorder %s17_s10, %s17_s10 }
   0x9   :  { %p228_p3 = scmp.ne.s32.totalorder %s17_s10, %s227_s18  ;;  %p233_p5 = scmp.lt.s32.totalorder %s227_s18, %s227_s18 }
   0xb   :  { %p234_p6 = por %p233_p5, %p232_p4 }
   0xd   :  { %p235_p7 = pnand %p234_p6, %p228_p3 }
   0xf   :  { %238 = shalt.err (!%p235_p7)
}
  0x10   :  { %s266_s19 = smov 64   ;;  %s267_s20 = smov 4  }
  0x11   :  { %22 = dma.hbm_to_vmem [thread:$0]  %s324_s1, 1344, %s17_s10, [#allocation3], %s266_s19, %s266_s19, %s267_s20  }
  0x12   :  { %261 = dma.done.wait [#allocation3], 1344  }
  0x13   :  { %262 = vsyncadd [#allocation3], 4294965952  ;;  %v268_v0 = vmov 0   ;;  %v206_v1 = vld [vmem:[#allocation2] sm:$0xff]   ;;  %v207_v2 = vld [vmem:[#allocation2 + $0x8] sm:$0xff]   ;;  %vm117_vm0 = vcmask 277504  }
  0x14   :  { %125 = vmatprep.subr.bf16.mxu0 %v268_v0  ;;  %v208_v3 = vld [vmem:[#allocation2 + $0x10] sm:$0xff]   ;;  %v209_v4 = vld [vmem:[#allocation2 + $0x18] sm:$0xff]   ;;  %v30_v6 = vld [vmem:[%s323_s0 + $0x18] sm:$0xff]  ;;  %vm121_vm1 = vcmask 1040384  }
  0x15   :  { %126 = vmatpush1.bf16.msra.mxu0 %v206_v1  ;;  %v28_v5 = vld [vmem:[%s323_s0 + $0x8] sm:$0xff]  ;;  %v210_v8 = vld [vmem:[#allocation2 + $0x20] sm:$0xff]   ;;  %v211_v9 = vld [vmem:[#allocation2 + $0x28] sm:$0xff]  }
  0x16   :  { %127 = vmatprep.subr.bf16.mxu0 %v268_v0  ;;  %v32_v7 = vpack.c.bf16 %v30_v6, %v28_v5  ;;  %v212_v10 = vld [vmem:[#allocation2 + $0x30] sm:$0xff]   ;;  %v213_v11 = vld [vmem:[#allocation2 + $0x38] sm:$0xff]   ;;  %v214_v12 = vld [vmem:[#allocation2 + $0x40] sm:$0xff]  }
  0x17   :  { %v215_v13 = vld [vmem:[#allocation2 + $0x48] sm:$0xff]   ;;  %v216_v14 = vld [vmem:[#allocation2 + $0x50] ss:$0 sps:$4 sm:$0x11]   ;;  %v29_v16 = vld [vmem:[%s323_s0 + $0x10] sm:$0xff] }
  0x18   :  { %198 = vmatprep.mubr.msk.bf16.mxu0 %vm117_vm0, %v32_v7  ;;  %v27_v15 = vld [vmem:[%s323_s0] sm:$0xff]  ;;  %v123_v17 = vsel %vm121_vm1, %v216_v14, 0 }
  0x19   :  { %128 = vmatpush1.bf16.msra.mxu0 %v207_v2  ;;  %v31_v18 = vpack.c.bf16 %v29_v16, %v27_v15 }
  0x1a   :  { %129 = vmatprep.subr.bf16.mxu0 %v268_v0 }
  0x1d   :  { %130 = vmatpush1.bf16.msra.mxu0 %v208_v3 }
  0x1e   :  { %131 = vmatprep.subr.bf16.mxu0 %v268_v0 }
  0x21   :  { %132 = vmatpush1.bf16.msra.mxu0 %v209_v4 }
  0x22   :  { %133 = vmatprep.subr.bf16.mxu0 %v268_v0 }
  0x25   :  { %134 = vmatpush1.bf16.msra.mxu0 %v210_v8 }
  0x26   :  { %135 = vmatprep.subr.bf16.mxu0 %v268_v0 }
  0x29   :  { %136 = vmatpush1.bf16.msra.mxu0 %v211_v9 }
  0x2a   :  { %137 = vmatprep.subr.bf16.mxu0 %v268_v0 }
  0x2d   :  { %138 = vmatpush1.bf16.msra.mxu0 %v212_v10 }
  0x2e   :  { %139 = vmatprep.subr.bf16.mxu0 %v268_v0 }
  0x31   :  { %140 = vmatpush1.bf16.msra.mxu0 %v213_v11 }
  0x32   :  { %141 = vmatprep.subr.bf16.mxu0 %v268_v0 }
  0x35   :  { %142 = vmatpush1.bf16.msra.mxu0 %v214_v12 }
  0x36   :  { %143 = vmatprep.subr.bf16.mxu0 %v268_v0 }
  0x39   :  { %144 = vmatpush1.bf16.msra.mxu0 %v215_v13 }
  0x3a   :  { %145 = vmatprep.subr.bf16.mxu0 %v268_v0 }
  0x3d   :  { %146 = vmatpush1.bf16.msra.mxu0 %v123_v17 }
  0x40   :  { %158 = vmatmul.mubr.bf16.vlgmr.msra.gmra.mrb[0].mxu0 %v31_v18 }
 0x113   :  { %v159_v19 = vpop.f32.mrb[0].mxu0 }
 0x114   :  { %v166_v20 = vmul.f32 0.14285715, %v159_v19  ;;  %v161_v21 = vpop.f32.mrb[1].mxu0 }
 0x115   :  { %v162_v22 = vpop.f32.mrb[2].mxu0 }
 0x116   :  { %168 = vst [vmem:[#allocation5] sm:$0xff] %v166_v20  ;;  %v167_v23 = vmul.f32 0.14285715, %v162_v22  ;;  %v164_v24 = vpop.f32.mrb[3].mxu0 }
 0x118   :  { %169 = vst [vmem:[#allocation5 + $0x8] sm:$0xff] %v167_v23 }
 0x119   :  { %174 = vsyncadd [#allocation4], 128  ;;  %s269_s30 = smov [#allocation5]  }
 0x11a   :  { %s175_s3 = sshll.u32 %s269_s30, 4  ;;  %s176_s3 = int_to_ptr.vmem [resolvable:$true] %s175_s3 }
 0x11b   :  { %s239_s4 = scalar_lea.vmem %s176_s3, 128  ;;  %s243_s0 = scalar_lea.vmem %s176_s3, 256 }
 0x11c   :  { %p240_p8 = scmp.ne.s32.totalorder %s176_s3, %s239_s4  ;;  %p244_p9 = scmp.lt.s32.totalorder %s176_s3, %s176_s3 }
 0x11d   :  { %p245_p10 = scmp.lt.s32.totalorder %s243_s0, %s239_s4 }
 0x11f   :  { %p246_p11 = por %p245_p10, %p244_p9 }
 0x121   :  { %p247_p12 = pnand %p246_p11, %p240_p8 }
 0x123   :  { %250 = shalt.err (!%p247_p12)
}
 0x124   :  { %s251_s7 = scalar_lea.hbm %s325_s2, 128 }
 0x125   :  { %p252_p13 = scmp.ne.s32.totalorder %s325_s2, %s251_s7  ;;  %p255_p0 = scmp.lt.u32.totalorder %s251_s7, %s325_s2 }
 0x127   :  { %p257_p1 = pnand %p255_p0, %p252_p13 }
 0x129   :  { %260 = shalt.err (!%p257_p1)
}
 0x12a   :  { %s270_s12 = smov 128   ;;  %s271_s13 = smov 8  }
 0x12b   :  { %181 = dma.vmem_to_hbm [thread:$0]  %s176_s3, 128, %s325_s2, [#allocation4], %s270_s12, %s270_s12, %s271_s13  }
 0x12c   :  { %263 = dma.done.wait [#allocation4], 256  }
 0x12d   :  { %264 = vsyncadd [#allocation4], 4294967040 }
 0x12e   :  { %185 = vsyncpa [#allocation3], 1 }
 0x12f   :  { %186 = vsyncpa [#allocation4], 1 }

</bundles_post_ra>
